<compile_context>
chip_gen: v7x
topology: tpu7x:2x2x1
jax: 0.10.0
libtpu: 0.0.40
codegen_flags: <defaults>
</compile_context>

<pallas_src>
import math

import jax
import jax.numpy as jnp
from jax.experimental import pallas as pl
from jax.experimental.pallas import tpu as pltpu


def _round_up(x, m):
    return ((x + m - 1) // m) * m


def _pick_tile(n_p, max_mult=4):
    """Largest tile (multiple of 128, <= 128*max_mult) that evenly divides n_p."""
    m = n_p // 128
    for d in range(min(max_mult, m), 0, -1):
        if m % d == 0:
            return 128 * d
    return 128


def _block_bytes(shape, dtype):
    size = 1
    for s in shape:
        size *= int(s)
    return size * jnp.dtype(dtype).itemsize


# ------------------------------ Pallas kernels --------------------------------

def _make_expand_kernel(tk, tm, linear_shortcut):
    """cin <= cout: accumulate Ahat@x over the N contraction, apply the GCN
    weight, folded BN affine, ReLU, shortcut and final ReLU in the epilogue."""

    def kernel(adj_ref, x_ref, w_ref, scale_ref, shift_ref, *rest):
        if linear_shortcut:
            wst_ref, bs_ref, o_ref, acc_ref = rest
        else:
            o_ref, acc_ref = rest

        i = pl.program_id(0)
        k = pl.program_id(1)

        @pl.when(k == 0)
        def _():
            acc_ref[...] = jnp.zeros_like(acc_ref)

        # (Ahat @ x) partial sum; x is VMEM-resident bf16, sliced per k-step.
        ks = pl.multiple_of(k * tk, tk)
        acc_ref[...] += jnp.dot(adj_ref[...], x_ref[pl.ds(ks, tk), :],
                                preferred_element_type=jnp.float32)

        @pl.when(k == pl.num_programs(1) - 1)
        def _():
            # GCN weight: agg = (Ahat @ x) @ W   (W pre-transposed [Cin, Cout]).
            agg = jnp.dot(acc_ref[...].astype(jnp.bfloat16), w_ref[...],
                          preferred_element_type=jnp.float32)
            # BatchNorm1d(eval) + GCN bias folded into one affine, then ReLU.
            h = jnp.maximum(agg * scale_ref[...] + shift_ref[...], 0.0)
            # Dropout: identity in eval mode.
            rs = pl.multiple_of(i * tm, tm)
            xrows = x_ref[pl.ds(rs, tm), :]           # shortcut rows (resident)
            if linear_shortcut:
                res = jnp.dot(xrows, wst_ref[...],
                              preferred_element_type=jnp.float32) + bs_ref[...]
            else:
                res = xrows.astype(jnp.float32)       # nn.Identity shortcut
            o_ref[...] = jnp.maximum(h + res, 0.0).astype(o_ref.dtype)

    return kernel


def _make_contract_kernel(tk):
    """cin > cout: xW and the linear shortcut are precomputed on the host
    (only N*Cin*Cout flops); kernel accumulates Ahat @ (xW) over k and applies
    the folded BN affine, ReLU, shortcut add and final ReLU."""

    def kernel(adj_ref, v_ref, scale_ref, shift_ref, res_ref, o_ref, acc_ref):
        k = pl.program_id(1)

        @pl.when(k == 0)
        def _():
            acc_ref[...] = jnp.zeros_like(acc_ref)

        ks = pl.multiple_of(k * tk, tk)
        acc_ref[...] += jnp.dot(adj_ref[...], v_ref[pl.ds(ks, tk), :],
                                preferred_element_type=jnp.float32)

        @pl.when(k == pl.num_programs(1) - 1)
        def _():
            h = jnp.maximum(acc_ref[...] * scale_ref[...] + shift_ref[...], 0.0)
            o_ref[...] = jnp.maximum(h + res_ref[...], 0.0).astype(o_ref.dtype)

    return kernel


# --------------------------------- wrapper -----------------------------------

def residual_block_forward(adj, x, params, *, bn_eps=1e-5, out_dtype=jnp.float32):
    """Eval-mode forward of one ResidualBlock.

    adj : [N, N] dense symmetric-normalized adjacency (f32)
    x   : [N, Cin] node features (f32 or bf16)
    returns [N, Cout] in `out_dtype` (use bf16 for chained intermediate blocks).
    """
    n, cin = x.shape
    cout = params["w_gcn"].shape[0]
    has_linear_shortcut = "w_short" in params

    # Lane-dense padding (multiples of 128 everywhere, even for tiny graphs).
    cin_p = _round_up(cin, 128)
    cout_p = _round_up(cout, 128)
    n_p = _round_up(n, 128)

    tk = _pick_tile(n_p)              # contraction tile (<= 512)
    tm = _pick_tile(n_p)              # row tile        (<= 512)
    if n_p // tm == 1:
        # Guarantee >= 2 row tiles on the parallel axis so both v7x TCs work.
        tm = n_p // 2                 # multiple of 64 -> sublane aligned

    xf = x.astype(jnp.float32)

    # Host-side padding / casting (done once, outside the kernel).
    adj_p = jnp.zeros((n_p, n_p), jnp.bfloat16).at[:n, :n].set(
        adj.astype(jnp.bfloat16))

    # Fold BN(eval) + GCN bias:  h = agg * scale + shift.
    scale_c = params["gamma"] * jax.lax.rsqrt(params["running_var"] + bn_eps)
    shift_c = params["beta"] + (params["b_gcn"] - params["running_mean"]) * scale_c
    scale = jnp.zeros((1, cout_p), jnp.float32).at[0, :cout].set(scale_c)
    shift = jnp.zeros((1, cout_p), jnp.float32).at[0, :cout].set(shift_c)

    expand = cin <= cout              # matmul ordering selection

    if expand:
        # x resident in VMEM (bf16); W applied in the kernel epilogue.
        x_p = jnp.zeros((n_p, cin_p), jnp.bfloat16).at[:n, :cin].set(
            x.astype(jnp.bfloat16))
        wt = jnp.zeros((cin_p, cout_p), jnp.bfloat16).at[:cin, :cout].set(
            params["w_gcn"].T.astype(jnp.bfloat16))
        args = [adj_p, x_p, wt, scale, shift]
        in_specs = [
            pl.BlockSpec((tm, tk), lambda i, k: (i, k)),          # Ahat tile
            pl.BlockSpec((n_p, cin_p), lambda i, k: (0, 0)),      # x (resident)
            pl.BlockSpec((cin_p, cout_p), lambda i, k: (0, 0)),   # W (resident)
            pl.BlockSpec((1, cout_p), lambda i, k: (0, 0)),       # scale
            pl.BlockSpec((1, cout_p), lambda i, k: (0, 0)),       # shift
        ]
        if has_linear_shortcut:
            wst = jnp.zeros((cin_p, cout_p), jnp.bfloat16).at[:cin, :cout].set(
                params["w_short"].T.astype(jnp.bfloat16))
            bs = jnp.zeros((1, cout_p), jnp.float32).at[0, :cout].set(
                params["b_short"])
            args += [wst, bs]
            in_specs += [
                pl.BlockSpec((cin_p, cout_p), lambda i, k: (0, 0)),
                pl.BlockSpec((1, cout_p), lambda i, k: (0, 0)),
            ]
        kernel = _make_expand_kernel(tk, tm, has_linear_shortcut)
        acc_width = cin_p
    else:
        # Contraction block: precompute xW (and the linear shortcut) on host so
        # the dominant N^2 contraction is only cout wide.
        v = jnp.dot(xf, params["w_gcn"].T)                        # [N, Cout]
        v_p = jnp.zeros((n_p, cout_p), jnp.bfloat16).at[:n, :cout].set(
            v.astype(jnp.bfloat16))
        if has_linear_shortcut:
            res = jnp.dot(xf, params["w_short"].T) + params["b_short"]
        else:
            res = xf                                              # cin == cout
        # f32 residual stream: one pass over N rows, negligible vs the N^2 adj.
        res_p = jnp.zeros((n_p, cout_p), jnp.float32).at[:n, :cout].set(res)
        args = [adj_p, v_p, scale, shift, res_p]
        in_specs = [
            pl.BlockSpec((tm, tk), lambda i, k: (i, k)),          # Ahat tile
            pl.BlockSpec((n_p, cout_p), lambda i, k: (0, 0)),     # xW (resident)
            pl.BlockSpec((1, cout_p), lambda i, k: (0, 0)),       # scale
            pl.BlockSpec((1, cout_p), lambda i, k: (0, 0)),       # shift
            pl.BlockSpec((tm, cout_p), lambda i, k: (i, 0)),      # shortcut rows
        ]
        kernel = _make_contract_kernel(tk)
        acc_width = cout_p

    # Explicit VMEM budget from the actual buffer sizes (x2 for double
    # buffering of every pipelined block), since the default scoped limit is
    # only 16 MiB on v5e / 32 MiB on v6e-v7x.
    # (pipeline_mode=pl.Buffered(3) on the adjacency spec is a possible extra
    #  sweep knob if profiling shows exposed DMA at the epilogue steps.)
    needed = 0
    for a, s in zip(args, in_specs):
        needed += 2 * _block_bytes(s.block_shape, a.dtype)
    needed += 2 * _block_bytes((tm, cout_p), out_dtype)           # output
    needed += _block_bytes((tm, acc_width), jnp.float32)          # accumulator
    vmem_limit = min(100 << 20, max(32 << 20, int(needed * 1.5) + (4 << 20)))

    out = pl.pallas_call(
        kernel,
        out_shape=jax.ShapeDtypeStruct((n_p, cout_p), out_dtype),
        grid=(n_p // tm, n_p // tk),
        in_specs=in_specs,
        out_specs=pl.BlockSpec((tm, cout_p), lambda i, k: (i, 0)),
        scratch_shapes=[pltpu.VMEM((tm, acc_width), jnp.float32)],
        compiler_params=pltpu.CompilerParams(
            dimension_semantics=("parallel", "arbitrary"),
            vmem_limit_bytes=vmem_limit),
    )(*args)
    return out[:n, :cout]


# ---------------------------- parameters / graph ------------------------------

def _xavier_uniform(key, fan_out, fan_in, gain):
    bound = gain * math.sqrt(6.0 / (fan_in + fan_out))
    return jax.random.uniform(key, (fan_out, fan_in), jnp.float32, -bound, bound)


def init_residual_block_params(key, in_channels, out_channels):
    """Matches ResidualBlock.reset_parameters() in eval mode."""
    relu_gain = math.sqrt(2.0)
    k_conv, k_short = jax.random.split(key)
    params = dict(
        w_gcn=_xavier_uniform(k_conv, out_channels, in_channels, relu_gain),
        b_gcn=jnp.zeros((out_channels,), jnp.float32),
        gamma=jnp.ones((out_channels,), jnp.float32),
        beta=jnp.zeros((out_channels,), jnp.float32),
        running_mean=jnp.zeros((out_channels,), jnp.float32),
        running_var=jnp.ones((out_channels,), jnp.float32),
    )
    if in_channels != out_channels:
        params["w_short"] = _xavier_uniform(k_short, out_channels, in_channels, 1.0)
        params["b_short"] = jnp.zeros((out_channels,), jnp.float32)
    # else: nn.Identity shortcut -> no params, no eye() matmul in the kernel.
    return params


def build_normalized_adjacency(edge_index, n):
    """Dense GCN normalization: Ahat = D^-1/2 (A + I) D^-1/2 with A[dst, src]=1.

    Duplicate edges are coalesced and exactly one self loop is used per node
    (matches PyG gcn_norm on a coalesced edge_index). deg is the in-degree
    including self loops, as in PyG's gcn_norm.
    """
    src = edge_index[0]
    dst = edge_index[1]
    a = jnp.zeros((n, n), jnp.float32).at[dst, src].set(1.0)
    a = jnp.maximum(a, jnp.eye(n, dtype=jnp.float32))
    deg = jnp.sum(a, axis=1)
    dinv = jnp.where(deg > 0, jax.lax.rsqrt(deg), 0.0)
    return a * dinv[:, None] * dinv[None, :]


# ------------------------------------ main ------------------------------------

if __name__ == "__main__":
    key = jax.random.PRNGKey(0)

    N = 16                 # graph nodes
    IN_CHANNELS = 8
    MID_CHANNELS = 16
    OUT_CHANNELS = 8
    E = 32                 # edges

    key, k_x, k_src, k_dst, k_p1, k_p2, k_p3 = jax.random.split(key, 7)
    x = jax.random.normal(k_x, (N, IN_CHANNELS), jnp.float32)
    edge_index = jnp.stack([
        jax.random.randint(k_src, (E,), 0, N, dtype=jnp.int32),
        jax.random.randint(k_dst, (E,), 0, N, dtype=jnp.int32),
    ])                                                     # [2, E]

    adj = build_normalized_adjacency(edge_index, N)

    # Expansion block with a Linear shortcut (8 -> 16); bf16 intermediate out.
    p1 = init_residual_block_params(k_p1, IN_CHANNELS, MID_CHANNELS)
    y = residual_block_forward(adj, x, p1, out_dtype=jnp.bfloat16)
    # Identity-shortcut block (16 -> 16); bf16 intermediate out.
    p2 = init_residual_block_params(k_p2, MID_CHANNELS, MID_CHANNELS)
    y = residual_block_forward(adj, y, p2, out_dtype=jnp.bfloat16)
    # Contraction block (16 -> 8): precomputed x@W path, f32 final output.
    p3 = init_residual_block_params(k_p3, MID_CHANNELS, OUT_CHANNELS)
    y = residual_block_forward(adj, y, p3, out_dtype=jnp.float32)

    y = jax.block_until_ready(y)
    assert y.shape == (N, OUT_CHANNELS)
    assert bool(jnp.all(jnp.isfinite(y)))
    print("KERNEL_OK")
</pallas_src>

<mosaic_0001>
module attributes {stable_mosaic.version = 11 : i64} {
  func.func @kernel(%arg0: i32, %arg1: i32, %arg2: memref<64x128xbf16, #tpu.memory_space<vmem>>, %arg3: memref<128x128xbf16, #tpu.memory_space<vmem>>, %arg4: memref<128x128xbf16, #tpu.memory_space<vmem>>, %arg5: memref<1x128xf32, #tpu.memory_space<vmem>>, %arg6: memref<1x128xf32, #tpu.memory_space<vmem>>, %arg7: memref<128x128xbf16, #tpu.memory_space<vmem>>, %arg8: memref<1x128xf32, #tpu.memory_space<vmem>>, %arg9: memref<64x128xbf16, #tpu.memory_space<vmem>>, %arg10: memref<64x128xf32, #tpu.memory_space<vmem>>) attributes {dimension_semantics = [#tpu.dimension_semantics<parallel>, #tpu.dimension_semantics<arbitrary>], iteration_bounds = array<i64: 2, 1>, scalar_prefetch = 0 : i64, scratch_operands = 1 : i64, tpu.core_type = #tpu.core_type<tc>, window_params = [{transform_indices = @transform_0, window_bounds = array<i64: 64, 128>}, {pipeline_mode = #tpu.pipeline_mode<synchronous>, transform_indices = @transform_1, window_bounds = array<i64: 128, 128>}, {pipeline_mode = #tpu.pipeline_mode<synchronous>, transform_indices = @transform_2, window_bounds = array<i64: 128, 128>}, {pipeline_mode = #tpu.pipeline_mode<synchronous>, transform_indices = @transform_3, window_bounds = array<i64: 1, 128>}, {pipeline_mode = #tpu.pipeline_mode<synchronous>, transform_indices = @transform_4, window_bounds = array<i64: 1, 128>}, {pipeline_mode = #tpu.pipeline_mode<synchronous>, transform_indices = @transform_5, window_bounds = array<i64: 128, 128>}, {pipeline_mode = #tpu.pipeline_mode<synchronous>, transform_indices = @transform_6, window_bounds = array<i64: 1, 128>}, {transform_indices = @transform_7, window_bounds = array<i64: 64, 128>}]} {
    %c0_i32 = arith.constant 0 : i32
    %0 = arith.cmpi eq, %arg1, %c0_i32 : i32
    %1 = arith.extui %0 : i1 to i32
    %c0_i32_0 = arith.constant 0 : i32
    %2 = arith.cmpi ne, %1, %c0_i32_0 : i32
    scf.if %2 {
      %cst_9 = arith.constant 0.000000e+00 : f32
      %15 = vector.broadcast %cst_9 : f32 to vector<64x128xf32>
      %c0_10 = arith.constant 0 : index
      %c0_11 = arith.constant 0 : index
      %16 = vector.load %arg10[%c0_10, %c0_11] : memref<64x128xf32, #tpu.memory_space<vmem>>, vector<64x128xf32>
      tpu.vector_store %arg10[%c0_10, %c0_11], %15 {strides = array<i32>} : memref<64x128xf32, #tpu.memory_space<vmem>>, vector<64x128xf32>,
    } else {
    }
    %c128_i32 = arith.constant 128 : i32
    %3 = arith.muli %arg1, %c128_i32 : i32
    %4 = tpu.assume_multiple %3, 128 : i32
    %c0 = arith.constant 0 : index
    %c0_1 = arith.constant 0 : index
    %5 = vector.load %arg10[%c0, %c0_1] : memref<64x128xf32, #tpu.memory_space<vmem>>, vector<64x128xf32>
    %c0_2 = arith.constant 0 : index
    %c0_3 = arith.constant 0 : index
    %6 = vector.load %arg2[%c0_2, %c0_3] : memref<64x128xbf16, #tpu.memory_space<vmem>>, vector<64x128xbf16>
    %7 = arith.index_cast %4 : i32 to index
    %c0_4 = arith.constant 0 : index
    %8 = vector.load %arg3[%7, %c0_4] : memref<128x128xbf16, #tpu.memory_space<vmem>>, vector<128x128xbf16>
    %cst = arith.constant dense<0.000000e+00> : vector<64x128xf32>
    %9 = tpu.matmul %6, %8, %cst {dimension_numbers = #tpu.dot_dimension_numbers<[1], [0], [0], [1], [0, 0, 1, 1], [], []>} : vector<64x128xbf16>, vector<128x128xbf16>, vector<64x128xf32> -> vector<64x128xf32>
    %10 = arith.addf %5, %9 : vector<64x128xf32>
    %c0_5 = arith.constant 0 : index
    %c0_6 = arith.constant 0 : index
    %11 = vector.load %arg10[%c0_5, %c0_6] : memref<64x128xf32, #tpu.memory_space<vmem>>, vector<64x128xf32>
    tpu.vector_store %arg10[%c0_5, %c0_6], %10 {strides = array<i32>} : memref<64x128xf32, #tpu.memory_space<vmem>>, vector<64x128xf32>,
    %c0_i32_7 = arith.constant 0 : i32
    %12 = arith.cmpi eq, %arg1, %c0_i32_7 : i32
    %13 = arith.extui %12 : i1 to i32
    %c0_i32_8 = arith.constant 0 : i32
    %14 = arith.cmpi ne, %13, %c0_i32_8 : i32
    scf.if %14 {
      %c0_9 = arith.constant 0 : index
      %c0_10 = arith.constant 0 : index
      %15 = vector.load %arg10[%c0_9, %c0_10] : memref<64x128xf32, #tpu.memory_space<vmem>>, vector<64x128xf32>
      %16 = arith.truncf %15 : vector<64x128xf32> to vector<64x128xbf16>
      %c0_11 = arith.constant 0 : index
      %c0_12 = arith.constant 0 : index
      %17 = vector.load %arg4[%c0_11, %c0_12] : memref<128x128xbf16, #tpu.memory_space<vmem>>, vector<128x128xbf16>
      %cst_13 = arith.constant dense<0.000000e+00> : vector<64x128xf32>
      %18 = tpu.matmul %16, %17, %cst_13 {dimension_numbers = #tpu.dot_dimension_numbers<[1], [0], [0], [1], [0, 0, 1, 1], [], []>} : vector<64x128xbf16>, vector<128x128xbf16>, vector<64x128xf32> -> vector<64x128xf32>
      %c0_14 = arith.constant 0 : index
      %c0_15 = arith.constant 0 : index
      %19 = vector.load %arg5[%c0_14, %c0_15] : memref<1x128xf32, #tpu.memory_space<vmem>>, vector<1x128xf32>
      %20 = vector.broadcast %19 : vector<1x128xf32> to vector<64x128xf32>
      %21 = arith.mulf %18, %20 : vector<64x128xf32>
      %c0_16 = arith.constant 0 : index
      %c0_17 = arith.constant 0 : index
      %22 = vector.load %arg6[%c0_16, %c0_17] : memref<1x128xf32, #tpu.memory_space<vmem>>, vector<1x128xf32>
      %23 = vector.broadcast %22 : vector<1x128xf32> to vector<64x128xf32>
      %24 = arith.addf %21, %23 : vector<64x128xf32>
      %cst_18 = arith.constant 0.000000e+00 : f32
      %25 = vector.broadcast %cst_18 : f32 to vector<64x128xf32>
      %26 = arith.maximumf %24, %25 : vector<64x128xf32>
      %c64_i32 = arith.constant 64 : i32
      %27 = arith.muli %arg0, %c64_i32 : i32
      %28 = tpu.assume_multiple %27, 64 : i32
      %29 = arith.index_cast %28 : i32 to index
      %c0_19 = arith.constant 0 : index
      %30 = vector.load %arg3[%29, %c0_19] : memref<128x128xbf16, #tpu.memory_space<vmem>>, vector<64x128xbf16>
      %c0_20 = arith.constant 0 : index
      %c0_21 = arith.constant 0 : index
      %31 = vector.load %arg7[%c0_20, %c0_21] : memref<128x128xbf16, #tpu.memory_space<vmem>>, vector<128x128xbf16>
      %cst_22 = arith.constant dense<0.000000e+00> : vector<64x128xf32>
      %32 = tpu.matmul %30, %31, %cst_22 {dimension_numbers = #tpu.dot_dimension_numbers<[1], [0], [0], [1], [0, 0, 1, 1], [], []>} : vector<64x128xbf16>, vector<128x128xbf16>, vector<64x128xf32> -> vector<64x128xf32>
      %c0_23 = arith.constant 0 : index
      %c0_24 = arith.constant 0 : index
      %33 = vector.load %arg8[%c0_23, %c0_24] : memref<1x128xf32, #tpu.memory_space<vmem>>, vector<1x128xf32>
      %34 = vector.broadcast %33 : vector<1x128xf32> to vector<64x128xf32>
      %35 = arith.addf %32, %34 : vector<64x128xf32>
      %36 = arith.addf %26, %35 : vector<64x128xf32>
      %cst_25 = arith.constant 0.000000e+00 : f32
      %37 = vector.broadcast %cst_25 : f32 to vector<64x128xf32>
      %38 = arith.maximumf %36, %37 : vector<64x128xf32>
      %39 = arith.truncf %38 : vector<64x128xf32> to vector<64x128xbf16>
      %c0_26 = arith.constant 0 : index
      %c0_27 = arith.constant 0 : index
      %40 = vector.load %arg9[%c0_26, %c0_27] : memref<64x128xbf16, #tpu.memory_space<vmem>>, vector<64x128xbf16>
      tpu.vector_store %arg9[%c0_26, %c0_27], %39 {strides = array<i32>} : memref<64x128xbf16, #tpu.memory_space<vmem>>, vector<64x128xbf16>,
    } else {
    }
    return
  }
  func.func @transform_0(%arg0: i32, %arg1: i32) -> (i32, i32) {
    %c0_i32 = arith.constant 0 : i32
    return %arg0, %arg1 : i32, i32
  }
  func.func @transform_1(%arg0: i32, %arg1: i32) -> (i32, i32) {
    %c0_i32 = arith.constant 0 : i32
    %c0_i32_0 = arith.constant 0 : i32
    %c0_i32_1 = arith.constant 0 : i32
    return %c0_i32, %c0_i32_0 : i32, i32
  }
  func.func @transform_2(%arg0: i32, %arg1: i32) -> (i32, i32) {
    %c0_i32 = arith.constant 0 : i32
    %c0_i32_0 = arith.constant 0 : i32
    %c0_i32_1 = arith.constant 0 : i32
    return %c0_i32, %c0_i32_0 : i32, i32
  }
  func.func @transform_3(%arg0: i32, %arg1: i32) -> (i32, i32) {
    %c0_i32 = arith.constant 0 : i32
    %c0_i32_0 = arith.constant 0 : i32
    %c0_i32_1 = arith.constant 0 : i32
    return %c0_i32, %c0_i32_0 : i32, i32
  }
  func.func @transform_4(%arg0: i32, %arg1: i32) -> (i32, i32) {
    %c0_i32 = arith.constant 0 : i32
    %c0_i32_0 = arith.constant 0 : i32
    %c0_i32_1 = arith.constant 0 : i32
    return %c0_i32, %c0_i32_0 : i32, i32
  }
  func.func @transform_5(%arg0: i32, %arg1: i32) -> (i32, i32) {
    %c0_i32 = arith.constant 0 : i32
    %c0_i32_0 = arith.constant 0 : i32
    %c0_i32_1 = arith.constant 0 : i32
    return %c0_i32, %c0_i32_0 : i32, i32
  }
  func.func @transform_6(%arg0: i32, %arg1: i32) -> (i32, i32) {
    %c0_i32 = arith.constant 0 : i32
    %c0_i32_0 = arith.constant 0 : i32
    %c0_i32_1 = arith.constant 0 : i32
    return %c0_i32, %c0_i32_0 : i32, i32
  }
  func.func @transform_7(%arg0: i32, %arg1: i32) -> (i32, i32) {
    %c0_i32 = arith.constant 0 : i32
    %c0_i32_0 = arith.constant 0 : i32
    return %arg0, %c0_i32 : i32, i32
  }
}

</mosaic_0001>

<bundles_post_ra>
// kernel: tpu_custom_call.1
= control target key start
LH: loop header
LB: loop body
LE: loop exit
PB: predicated region body
PF: predicated region fallthrough
CT: control target
= control target key end

     0   :  { %s2034_s0 = inlined_call_operand.hbm [shape: bf16[128,128], index: 0, kind: input, shape index: {}]   ;;  %s2035_s1 = inlined_call_operand.hbm [shape: bf16[128,128], index: 1, kind: input, shape index: {}]   ;;  %s2036_s2 = inlined_call_operand.hbm [shape: bf16[128,128], index: 2, kind: input, shape index: {}]   ;;  %s2037_s3 = inlined_call_operand.vmem [shape: f32[1,128], index: 3, kind: input, shape index: {}]   ;;  %s2038_s4 = inlined_call_operand.vmem [shape: f32[1,128], index: 4, kind: input, shape index: {}]   ;;  %s2039_s5 = inlined_call_operand.hbm [shape: bf16[128,128], index: 5, kind: input, shape index: {}]   ;;  %s2040_s6 = inlined_call_operand.vmem [shape: f32[1,128], index: 6, kind: input, shape index: {}]   ;;  %s2041_s7 = inlined_call_operand.hbm [shape: bf16[128,128], index: 7, kind: output, shape index: {}]  }
   0x1   :  { %2049 = sst [smem:[#allocation18_spill]] %s2040_s6 }
   0x2   :  { %2050 = sst [smem:[#allocation19_spill]] %s2041_s7 }
   0x3   :  { %12 = vsyncpa [#allocation4], 0 }
   0x4   :  { %14 = vsyncpa [#allocation4 + $0x1], 0 }
   0x5   :  { %15 = vsyncpa [#allocation7], 0 }
   0x6   :  { %16 = vsyncpa [#allocation10], 0 }
   0x7   :  { %17 = vsyncpa [#allocation5], 0 }
   0x8   :  { %19 = vsyncpa [#allocation5 + $0x1], 0  ;;  %s1709_s24 = smov 0   ;;  %s1711_s25 = smov 0  }
   0x9   :  { %s1713_s26 = smov 0   ;;  %s1715_s27 = smov 0  }
   0xa   :  { %s1717_s28 = smov 0   ;;  %s1719_s29 = smov 0  }
   0xb LB: > { %2051 = sst [smem:[#allocation16_spill]] %s1638_s24  ;;  %s1102_s30 = sadd.s32 4294967295, %s1658_s29   ;;  %s1658_s29 = sphi %s1719_s29, %s25_s29   ;;  %s1654_s28 = sphi %s1717_s28, %s2076_s28   ;;  %s1650_s27 = sphi %s1715_s27, %s2075_s27   ;;  %s1646_s26 = sphi %s1713_s26, %s2074_s26   ;;  %s1642_s25 = sphi %s1711_s25, %s2073_s25   ;;  %s1638_s24 = sphi %s1709_s24, %s2072_s24  }
   0xc   : > { %s1103_s8 = sadd.s32 4294967294, %s1658_s29   ;;  %p59_p0 = scmp.ne.s32.totalorder %s1642_s25, %s1638_s24 }
   0xd   : > { %p1743_p1 = scmp.eq.s32.totalorder %s1102_s30, 0  ;;  %p1747_p2 = scmp.eq.s32.totalorder %s1102_s30, 1 }
   0xe   : > { %p215_p3 = scmp.eq.s32.totalorder %s1103_s8, 1  ;;  %p1104_p5 = scmp.ge.s32.totalorder %s1658_s29, 1 }
   0xf   : > { %s2052_s9 = scalar_select %p1743_p1, 1, 0 }
  0x10   : > { %s2053_s10 = scalar_select %p1747_p2, 1, 0 }
  0x11   : > { %p1753_p4 = por %p1743_p1, %p59_p0  ;;  %p1758_p6 = por %p215_p3, %p59_p0 }
  0x12   : > { %p222_p7 = scmp.lt.s32.totalorder %s1658_s29, 3  ;;  %s1660_s14 = smov [#allocation6]  }
  0x13   : > { %s2054_s11 = scalar_select %p1753_p4, 1, 0 }
  0x14   : > { %s2055_s12 = scalar_select %p1758_p6, 1, 0 }
  0x15   : > { %p1763_p8 = pnand %p1104_p5, %p222_p7  ;;  %s234_s15 = sshll.u32 %s1660_s14, 4  ;;  %s1767_s15 = int_to_ptr.vmem [resolvable:$true] %s234_s15 }
  0x16   : > { %2056 = sst [smem:[#allocation17_spill]] %s2055_s12  ;;  %s1661_s17 = smov [#allocation8]  }
  0x17   : > { %s2057_s13 = scalar_select %p1763_p8, 1, 0 }
  0x18   : > { %p1341_p9 = pneg %p1763_p8  ;;  %s247_s18 = sshll.u32 %s1661_s17, 4  ;;  %s1778_s18 = int_to_ptr.vmem [resolvable:$true] %s247_s18 }
  0x19   : > { %s1662_s19 = smov [#allocation9]   ;;  %s1454_s23 = scalar_lea.hbm %s2035_s1, 1024 }
  0x1a   : > { %p1774_p11 = pnand %p1341_p9, %p1743_p1  ;;  %s1780_s20 = sshll.u32 %s1662_s19, 4  ;;  %s267_s20 = int_to_ptr.vmem [resolvable:$true] %s1780_s20 }
  0x1b   : > { %p1455_p12 = scmp.ne.s32.totalorder %s2035_s1, %s1454_s23  ;;  %p1461_p5 = scmp.lt.u32.totalorder %s1454_s23, %s2035_s1 }
  0x1c   : > { %p1790_p13 = pneg %p1774_p11 }
  0x1e   : > { %p1457_p0 = pnand %p1790_p13, %p1455_p12 }
  0x20   : > { %p1458_p3 = pneg %p1457_p0 }
  0x22   : > { %p1463_p7 = pnand %p1461_p5, %p1458_p3 }
  0x24   : > { %1466 = shalt.err (!%p1463_p7)
}
  0x25   : > { %s1467_s21 = scalar_lea.vmem %s1767_s15, 1024  ;;  %p1475_p1 = scmp.lt.s32.totalorder %s1767_s15, %s1767_s15 }
  0x26   : > { %p1468_p9 = scmp.ne.s32.totalorder %s1767_s15, %s1467_s21  ;;  %p1476_p4 = scmp.lt.s32.totalorder %s1467_s21, %s1467_s21 }
  0x28   : > { %p1470_p10 = pnand %p1468_p9, %p1790_p13  ;;  %p1477_p12 = por %p1476_p4, %p1475_p1 }
  0x2a   : > { %p1471_p6 = pneg %p1470_p10 }
  0x2c   : > { %p1478_p0 = pnand %p1477_p12, %p1471_p6 }
  0x2e   : > { %1481 = shalt.err (!%p1478_p0)
}
  0x2f   : > { %s1663_s22 = smov 64   ;;  %s1664_s23 = smov 4  }
  0x30   : > { %1344 = dma.hbm_to_vmem [thread:$0]  (!%p1774_p11), %s2035_s1, 1024, %s1767_s15, [#allocation7], %s1663_s22, %s1663_s22, %s1664_s23  }
  0x31   : > { %s1482_s21 = scalar_lea.hbm %s2036_s2, 1024 }
  0x32   : > { %p1483_p1 = scmp.ne.s32.totalorder %s2036_s2, %s1482_s21  ;;  %p1489_p10 = scmp.lt.u32.totalorder %s1482_s21, %s2036_s2 }
  0x34   : > { %p1485_p4 = pnand %p1483_p1, %p1790_p13 }
  0x36   : > { %p1486_p6 = pneg %p1485_p4 }
  0x38   : > { %p1491_p3 = pnand %p1489_p10, %p1486_p6 }
  0x3a   : > { %1494 = shalt.err (!%p1491_p3)
}
  0x3b   : > { %s1495_s15 = scalar_lea.vmem %s1778_s18, 1024  ;;  %p1503_p12 = scmp.lt.s32.totalorder %s1778_s18, %s1778_s18 }
  0x3c   : > { %p1496_p5 = scmp.ne.s32.totalorder %s1778_s18, %s1495_s15  ;;  %p1504_p0 = scmp.lt.s32.totalorder %s1495_s15, %s1495_s15 }
  0x3e   : > { %p1498_p7 = pnand %p1496_p5, %p1790_p13  ;;  %p1505_p1 = por %p1504_p0, %p1503_p12 }
  0x40   : > { %p1499_p9 = pneg %p1498_p7 }
  0x42   : > { %p1506_p4 = pnand %p1505_p1, %p1499_p9 }
  0x44   : > { %1509 = shalt.err (!%p1506_p4)
}
  0x45   : > { %1347 = dma.hbm_to_vmem [thread:$0]  (!%p1774_p11), %s2036_s2, 1024, %s1778_s18, [#allocation7], %s1663_s22, %s1663_s22, %s1664_s23  }
  0x46   : > { %s1510_s30 = scalar_lea.hbm %s2039_s5, 1024 }
  0x47   : > { %p1511_p6 = scmp.ne.s32.totalorder %s2039_s5, %s1510_s30  ;;  %p1517_p5 = scmp.lt.u32.totalorder %s1510_s30, %s2039_s5 }
  0x49   : > { %p1513_p10 = pnand %p1511_p6, %p1790_p13 }
  0x4b   : > { %p1514_p3 = pneg %p1513_p10 }
  0x4d   : > { %p1519_p7 = pnand %p1517_p5, %p1514_p3 }
  0x4f   : > { %1522 = shalt.err (!%p1519_p7)
}
  0x50   : > { %s1523_s15 = scalar_lea.vmem %s267_s20, 1024  ;;  %p1531_p1 = scmp.lt.s32.totalorder %s267_s20, %s267_s20 }
  0x51   : > { %p1524_p9 = scmp.ne.s32.totalorder %s267_s20, %s1523_s15  ;;  %p1532_p4 = scmp.lt.s32.totalorder %s1523_s15, %s1523_s15 }
  0x53   : > { %p1526_p12 = pnand %p1524_p9, %p1790_p13  ;;  %p1533_p8 = por %p1532_p4, %p1531_p1 }
  0x55   : > { %p1527_p0 = pneg %p1526_p12 }
  0x57   : > { %p1534_p2 = pnand %p1533_p8, %p1527_p0 }
  0x59   : > { %1537 = shalt.err (!%p1534_p2)
}
  0x5a   : > { %1350 = dma.hbm_to_vmem [thread:$0]  (!%p1774_p11), %s2039_s5, 1024, %s267_s20, [#allocation10], %s1663_s22, %s1663_s22, %s1664_s23  }
  0x5b   : > { %s46_s14 = sadd.s32 1, %s1646_s26  ;;  %s37_s16 = sadd.s32 1, %s1654_s28 }
  0x5c   : > { %p53_p2 = scmp.ne.s32.totalorder %s1646_s26, %s1642_s25  ;;  %p39_p8 = scmp.ge.s32.totalorder %s37_s16, 2 }
  0x5d   : > { %p54_p13 = scmp.eq.s32.totalorder %s1658_s29, 0  ;;  %p2060_p6 = scmp.ne.s32.totalorder %s2053_s10, 0 }
  0x5e   : > { %p1362_p3 = scmp.lt.s32.totalorder %s1658_s29, 2  ;;  %s2078_s16 = smov (%p39_p8, %s37_s16), 0 }
  0x5f   : > { %p1869_p10 = por %p2060_p6, %p53_p2  ;;  %p55_p5 = por %p54_p13, %p53_p2 }
  0x60   : > { %s283_s24 = sand.u32 1, %s1646_s26   ;;  %s41_s12 = ssub.s32 %s1654_s28, %s2078_s16 }
  0x61   : > { %p44_p7 = scmp.eq.s32.totalorder %s41_s12, 0  ;;  %s1109_s20 = sshll.u32 %s283_s24, 5 }
  0x62   : > { %s1168_s30 = sshll.u32 %s1654_s28, 9  ;;  %s287_s21 = scalar_lea.vmem [#allocation3], %s1109_s20 }
  0x63   : > { %s1881_s8 = scalar_select %p44_p7, %s1646_s26, %s46_s14  }
  0x64   : > { %s1886_s10 = scalar_lea.hbm %s2034_s0, %s1168_s30  ;;  %s295_s15 = sshll.u32 %s287_s21, 4  ;;  %s1888_s15 = int_to_ptr.vmem [resolvable:$true] %s295_s15 }
  0x65   : > { %p1892_p11 = pnand %p1362_p3, %p55_p5  ;;  %s1896_s6 = scalar_lea.sflag [#allocation4], %s283_s24 }
  0x66   : > { %s1538_s14 = scalar_lea.hbm %s1886_s10, 512  ;;  %s1543_s30 = scalar_lea.hbm %s2034_s0, 1024 }
  0x67   : > { %p1539_p9 = scmp.ne.s32.totalorder %s1886_s10, %s1538_s14  ;;  %p1540_p12 = pneg %p1892_p11 }
  0x68   : > { %p1544_p4 = scmp.lt.u32.totalorder %s1886_s10, %s2034_s0  ;;  %p1545_p2 = scmp.lt.u32.totalorder %s1543_s30, %s1538_s14 }
  0x69   : > { %p1541_p0 = pnand %p1540_p12, %p1539_p9  ;;  %p1547_p13 = scmp.lt.u32.totalorder %s1538_s14, %s1886_s10 }
  0x6a   : > { %p1546_p8 = por %p1545_p2, %p1544_p4 }
  0x6b   : > { %p1542_p1 = pneg %p1541_p0 }
  0x6c   : > { %p1548_p6 = por %p1547_p13, %p1546_p8 }
  0x6e   : > { %p1549_p3 = pnand %p1548_p6, %p1542_p1 }
  0x70   : > { %1552 = shalt.err (!%p1549_p3)
}
  0x71   : > { %s1553_s24 = scalar_lea.vmem %s1888_s15, 512  ;;  %s1665_s21 = smov [#allocation3]  }
  0x72   : > { %p1554_p5 = scmp.ne.s32.totalorder %s1888_s15, %s1553_s24  ;;  %s1558_s12 = sshll.u32 %s1665_s21, 4  ;;  %s1559_s12 = int_to_ptr.vmem [resolvable:$false] %s1558_s12 }
  0x73   : > { %s1560_s20 = scalar_lea.vmem %s1559_s12, 1024  ;;  %p1561_p0 = scmp.lt.s32.totalorder %s1888_s15, %s1559_s12 }
  0x74   : > { %p1556_p7 = pnand %p1554_p5, %p1540_p12  ;;  %p1562_p4 = scmp.lt.s32.totalorder %s1560_s20, %s1553_s24 }
  0x76   : > { %p1557_p9 = pneg %p1556_p7  ;;  %p1563_p2 = por %p1562_p4, %p1561_p0 }
  0x78   : > { %p1564_p8 = pnand %p1563_p2, %p1557_p9 }
  0x7a   : > { %1567 = shalt.err (!%p1564_p8)
}
  0x7b   : > { %1354 = dma.hbm_to_vmem [thread:$0]  (!%p1892_p11), %s1886_s10, 512, %s1888_s15, %s1896_s6, %s1663_s22, %s1663_s22, %s1664_s23  }
  0x7c   : > { %p2063_p12 = scmp.ne.s32.totalorder %s2057_s13, 0 }
  0x7d   : > { %s1930_s14 = sand.u32 (!%p2063_p12), 1, %s1642_s25   ;;  %p2064_p1 = scmp.ne.s32.totalorder (!%p2063_p12), %s2054_s11, 0 }
  0x7e   : > { %307 = sbr.rel (%p2063_p12) target bundleno = 660 (0x294), region = 48  ;;  %s1113_s30 = sshll.u32 (!%p2063_p12), %s1930_s14, 5 }
  0x7f   : > { %s310_s17 = scalar_lea.sflag (!%p2063_p12), [#allocation4], %s1930_s14  ;;  %s1936_s18 = scalar_lea.vmem (!%p2063_p12), [#allocation3], %s1113_s30 }
  0x85   : > { %1621 = dma.done.wait (%p2064_p1), %s310_s17, 512  }
  0x86   : > { %1623 = vsyncadd (%p2064_p1), %s310_s17, 4294966784  ;;  %p2065_p11 = scmp.ne.s32.totalorder %s2052_s9, 0 }
  0x88   : > { %1625 = dma.done.wait (%p2065_p11), [#allocation7], 2048  }
  0x89   : > { %1627 = vsyncadd (%p2065_p11), [#allocation7], 4294965248 }
  0x8a   : > { %1629 = dma.done.wait (%p2065_p11), [#allocation10], 1024  }
  0x8b   : > { %1631 = vsyncadd (%p2065_p11), [#allocation10], 4294966272  ;;  %v1422_v0 = vld [vmem:[#allocation6] sm:$0xff]   ;;  %v1423_v1 = vld [vmem:[#allocation6 + $0x8] sm:$0xff]   ;;  %s1140_s9 = sshll.u32 %s1650_s27, 6  ;;  %s2066_s21 = sld [smem:[#allocation18_spill]] }
  0x8c   : > { %1237 = vmatprep.subr.bf16.mxu0 %v1422_v0  ;;  %v1424_v2 = vld [vmem:[#allocation6 + $0x10] sm:$0xff]   ;;  %v1425_v3 = vld [vmem:[#allocation6 + $0x18] sm:$0xff]   ;;  %v1430_v4 = vld [vmem:[%s1936_s18] sm:$0xff]   ;;  %s744_s11 = sshra.s32 %s1140_s9, 3  ;;  %s1972_s12 = scalar_lea.vmem [#allocation11], %s1113_s30 }
  0x8d   : > { %1238 = vmatpush3.bf16.msra.mxu0 %v1422_v0  ;;  %1253 = vmatprep.mubr.bf16.mxu0 %v1430_v4  ;;  %v1426_v5 = vld [vmem:[#allocation6 + $0x20] sm:$0xff]   ;;  %v1435_v7 = vld [vmem:[#allocation8 + $0x8] sm:$0xff]   ;;  %v1437_v9 = vld [vmem:[#allocation8 + $0x10] sm:$0xff]   ;;  %s1141_s13 = sshll.u32 %s744_s11, 2  ;;  %s986_s20 = sshll.u32 %s1972_s12, 4  ;;  %s1978_s20 = int_to_ptr.vmem [resolvable:$true] %s986_s20 }
  0x8e   : > { %1239 = vmatprep.subr.bf16.mxu0 %v1423_v1  ;;  %v1434_v6 = vld [vmem:[#allocation8] sm:$0xff]   ;;  %v1427_v8 = vld [vmem:[#allocation6 + $0x28] sm:$0xff]   ;;  %v1428_v10 = vld [vmem:[#allocation6 + $0x30] sm:$0xff]   ;;  %s1955_s22 = scalar_lea.vmem [#allocation6], %s1141_s13  ;;  %s1177_s30 = sshll.u32 %s1650_s27, 9 }
  0x8f   : > { %1261 = vmatprep.subr.bf16.mxu1 %v1434_v6  ;;  %v1439_v11 = vld [vmem:[#allocation8 + $0x18] sm:$0xff]   ;;  %v1441_v13 = vld [vmem:[#allocation8 + $0x20] sm:$0xff]   ;;  %v1443_v15 = vld [vmem:[#allocation8 + $0x28] sm:$0xff]   ;;  %s2067_s9 = sld [smem:[#allocation19_spill]]  ;;  %s973_s13 = scalar_lea.sflag [#allocation5], %s1930_s14 }
  0x90   : > { %1262 = vmatpush3.bf16.msra.mxu1 %v1434_v6  ;;  %v1429_v12 = vld [vmem:[#allocation6 + $0x38] sm:$0xff]   ;;  %v1436_v14 = vld [vmem:[#allocation9] sm:$0xff]   ;;  %v1431_v16 = vld [vmem:[%s1936_s18 + $0x8] sm:$0xff]   ;;  %s1568_s27 = scalar_lea.vmem %s1978_s20, 512 }
  0x91   : > { %1240 = vmatpush3.bf16.msra.mxu0 %v1423_v1  ;;  %1263 = vmatprep.subr.bf16.mxu1 %v1435_v7  ;;  %v1432_v17 = vld [vmem:[%s1936_s18 + $0x10] sm:$0xff]   ;;  %v1438_v18 = vld [vmem:[#allocation9 + $0x8] sm:$0xff]   ;;  %v1433_v21 = vld [vmem:[%s1936_s18 + $0x18] sm:$0xff]   ;;  %p1569_p13 = scmp.ne.s32.totalorder %s1978_s20, %s1568_s27 }
  0x92   : > { %1241 = vmatprep.subr.bf16.mxu0 %v1424_v2  ;;  %v1445_v19 = vld [vmem:[#allocation8 + $0x30] sm:$0xff]   ;;  %v1442_v22 = vld [vmem:[#allocation9 + $0x18] sm:$0xff]   ;;  %v1444_v23 = vld [vmem:[#allocation9 + $0x20] sm:$0xff]  }
  0x93   : > { %v1440_v20 = vld [vmem:[#allocation9 + $0x10] sm:$0xff]   ;;  %v1446_v24 = vld [vmem:[#allocation9 + $0x28] sm:$0xff]   ;;  %v1447_v25 = vld [vmem:[#allocation8 + $0x38] sm:$0xff]   ;;  %p1570_p6 = pnand %p1569_p13, %p1869_p10 }
  0x94   : > { %1264 = vmatpush3.bf16.msra.mxu1 %v1435_v7  ;;  %v1448_v26 = vld [vmem:[#allocation9 + $0x30] sm:$0xff]   ;;  %v1449_v27 = vld [vmem:[#allocation9 + $0x38] sm:$0xff]   ;;  %v1450_v28 = vld [vmem:[%s1955_s22] sm:$0xff]  }
  0x95   : > { %1242 = vmatpush3.bf16.msra.mxu0 %v1424_v2  ;;  %1265 = vmatprep.subr.bf16.mxu1 %v1437_v9  ;;  %v1451_v29 = vld [vmem:[%s1955_s22 + $0x8] sm:$0xff]   ;;  %v1452_v42 = vld [vmem:[%s1955_s22 + $0x10] sm:$0xff]   ;;  %v1453_v43 = vld [vmem:[%s1955_s22 + $0x18] sm:$0xff]   ;;  %s1983_s11 = scalar_lea.hbm %s2067_s9, %s1177_s30  ;;  %p1571_p3 = pneg %p1570_p6 }
  0x96   : > { %1243 = vmatprep.subr.bf16.mxu0 %v1425_v3  ;;  %v1138_v48 = vld [vmem:[%s2037_s3] ss:$0 sm:$0xff]  ;;  %s1666_s22 = smov [#allocation11]  }
  0x97   : > { %v1139_v50 = vld [vmem:[%s2038_s4] ss:$0 sm:$0xff]  ;;  %s1572_s23 = sshll.u32 %s1666_s22, 4  ;;  %s1573_s23 = int_to_ptr.vmem [resolvable:$false] %s1572_s23 }
  0x98   : > { %1266 = vmatpush3.bf16.msra.mxu1 %v1437_v9  ;;  %v1142_v51 = vld [vmem:[%s2066_s21] ss:$0 sm:$0xff]  ;;  %s1574_s10 = scalar_lea.vmem %s1573_s23, 1024  ;;  %p1575_p5 = scmp.lt.s32.totalorder %s1978_s20, %s1573_s23 }
  0x99   : > { %1244 = vmatpush3.bf16.msra.mxu0 %v1425_v3  ;;  %1267 = vmatprep.subr.bf16.mxu1 %v1439_v11  ;;  %p1576_p7 = scmp.lt.s32.totalorder %s1574_s10, %s1568_s27 }
  0x9a   : > { %1245 = vmatprep.subr.bf16.mxu0 %v1426_v5 }
  0x9b   : > { %p1577_p9 = por %p1576_p7, %p1575_p5 }
  0x9c   : > { %1268 = vmatpush3.bf16.msra.mxu1 %v1439_v11 }
  0x9d   : > { %1246 = vmatpush3.bf16.msra.mxu0 %v1426_v5  ;;  %1269 = vmatprep.subr.bf16.mxu1 %v1441_v13  ;;  %p1578_p0 = pnand %p1577_p9, %p1571_p3 }
  0x9e   : > { %1247 = vmatprep.subr.bf16.mxu0 %v1427_v8 }
  0xa0   : > { %1270 = vmatpush3.bf16.msra.mxu1 %v1441_v13 }
  0xa1   : > { %1248 = vmatpush3.bf16.msra.mxu0 %v1427_v8  ;;  %1271 = vmatprep.subr.bf16.mxu1 %v1443_v15 }
  0xa2   : > { %1249 = vmatprep.subr.bf16.mxu0 %v1428_v10 }
  0xa4   : > { %1272 = vmatpush3.bf16.msra.mxu1 %v1443_v15 }
  0xa5   : > { %1250 = vmatpush3.bf16.msra.mxu0 %v1428_v10  ;;  %1273 = vmatprep.subr.bf16.mxu1 %v1445_v19 }
  0xa6   : > { %1251 = vmatprep.subr.bf16.mxu0 %v1429_v12 }
  0xa8   : > { %1274 = vmatpush3.bf16.msra.mxu1 %v1445_v19 }
  0xa9   : > { %1252 = vmatpush3.bf16.msra.mxu0 %v1429_v12  ;;  %1275 = vmatprep.subr.bf16.mxu1 %v1447_v25 }
  0xaa   : > { %1285 = vmatprep.subr.bf16.mxu0 %v1436_v14 }
  0xac   : > { %1254 = vmatmul.mubr.bf16.vlgmr.msra.gmra.mrb[0].mxu0 %v1431_v16  ;;  %1276 = vmatpush3.bf16.msra.mxu1 %v1447_v25 }
  0xad   : > { %1257 = vmatprep.mubr.bf16.mxu0 %v1432_v17  ;;  %1286 = vmatpush3.bf16.msra.mxu0 %v1436_v14 }
  0xae   : > { %1287 = vmatprep.subr.bf16.mxu0 %v1438_v18  ;;  %1309 = vmatprep.subr.bf16.mxu1 %v1436_v14 }
  0xb1   : > { %1288 = vmatpush3.bf16.msra.mxu0 %v1438_v18 }
  0xb2   : > { %1289 = vmatprep.subr.bf16.mxu0 %v1440_v20 }
  0xb4   : > { %1258 = vmatmul.mubr.bf16.gmra.mrb[4].mxu0 %v1433_v21 }
  0xb5   : > { %1290 = vmatpush3.bf16.msra.mxu0 %v1440_v20  ;;  %1301 = vmatprep.mubr.bf16.mxu0 %v1450_v28 }
  0xb6   : > { %1291 = vmatprep.subr.bf16.mxu0 %v1442_v22 }
  0xb9   : > { %1292 = vmatpush3.bf16.msra.mxu0 %v1442_v22 }
  0xba   : > { %1293 = vmatprep.subr.bf16.mxu0 %v1444_v23 }
  0xbd   : > { %1294 = vmatpush3.bf16.msra.mxu0 %v1444_v23 }
  0xbe   : > { %1295 = vmatprep.subr.bf16.mxu0 %v1446_v24 }
  0xc1   : > { %1296 = vmatpush3.bf16.msra.mxu0 %v1446_v24 }
  0xc2   : > { %1297 = vmatprep.subr.bf16.mxu0 %v1448_v26 }
  0xc5   : > { %1298 = vmatpush3.bf16.msra.mxu0 %v1448_v26 }
  0xc6   : > { %1299 = vmatprep.subr.bf16.mxu0 %v1449_v27 }
  0xc9   : > { %1300 = vmatpush3.bf16.msra.mxu0 %v1449_v27 }
  0xcc   : > { %1302 = vmatmul.mubr.bf16.vlgmr.msra.gmra.mrb[8].mxu0 %v1451_v29 }
 0x17f   : > { %v1255_v30 = vpop.f32.mrb[0].mxu0 }
 0x180   : > { %v514_v31 = vpop.f32.mrb[1].mxu0 }
 0x181   : > { %v1256_v32 = vpop.f32.mrb[2].mxu0 }
 0x182   : > { %v573_v33 = vpack.c.bf16 %v1256_v32, %v1255_v30  ;;  %v517_v34 = vpop.f32.mrb[3].mxu0 }
 0x183   : > { %v572_v35 = vpack.c.bf16 %v517_v34, %v514_v31 }
 0x185   : > { %1277 = vmatprep.mubr.bf16.mxu1 %v572_v35 }
 0x186   : > { %1278 = vmatmul.mubr.bf16.vlgmr.msra.gmra.mrb[0].mxu1 %v573_v33 }
 0x187   : > { %1317 = vmatpush3.bf16.msra.mxu1 %v1436_v14  ;;  %v1259_v36 = vpop.f32.mrb[4].mxu0 }
 0x188   : > { %1310 = vmatprep.subr.bf16.mxu1 %v1438_v18  ;;  %v530_v37 = vpop.f32.mrb[5].mxu0 }
 0x189   : > { %v1260_v38 = vpop.f32.mrb[6].mxu0 }
 0x18a   : > { %v575_v39 = vpack.c.bf16 %v1260_v38, %v1259_v36  ;;  %v533_v40 = vpop.f32.mrb[7].mxu0 }
 0x18b   : > { %1318 = vmatpush3.bf16.msra.mxu1 %v1438_v18  ;;  %v574_v41 = vpack.c.bf16 %v533_v40, %v530_v37 }
 0x18c   : > { %1311 = vmatprep.subr.bf16.mxu1 %v1440_v20 }
 0x18d   : > { %1281 = vmatprep.mubr.bf16.mxu1 %v574_v41 }
 0x18e   : > { %1282 = vmatmul.mubr.bf16.gmra.mrb[4].mxu1 %v575_v39 }
 0x18f   : > { %1319 = vmatpush3.bf16.msra.mxu1 %v1440_v20  ;;  %1305 = vmatprep.mubr.bf16.mxu1 %v1452_v42 }
 0x190   : > { %1312 = vmatprep.subr.bf16.mxu1 %v1442_v22 }
 0x193   : > { %1320 = vmatpush3.bf16.msra.mxu1 %v1442_v22 }
 0x194   : > { %1313 = vmatprep.subr.bf16.mxu1 %v1444_v23 }
 0x197   : > { %1321 = vmatpush3.bf16.msra.mxu1 %v1444_v23 }
 0x198   : > { %1314 = vmatprep.subr.bf16.mxu1 %v1446_v24 }
 0x19b   : > { %1322 = vmatpush3.bf16.msra.mxu1 %v1446_v24 }
 0x19c   : > { %1315 = vmatprep.subr.bf16.mxu1 %v1448_v26 }
 0x19f   : > { %1323 = vmatpush3.bf16.msra.mxu1 %v1448_v26  ;;  %v1303_v44 = vpop.f32.mrb[8].mxu0 }
 0x1a0   : > { %1316 = vmatprep.subr.bf16.mxu1 %v1449_v27  ;;  %v885_v45 = vpop.f32.mrb[9].mxu0  ;;  %v894_v59 = vadd.f32 %v1303_v44, %v1142_v51 }
 0x1a1   : > { %v1304_v46 = vpop.f32.mrb[10].mxu0  ;;  %v886_v62 = vadd.f32 %v1142_v51, %v885_v45 }
 0x1a2   : > { %v888_v47 = vpop.f32.mrb[11].mxu0  ;;  %v897_v1 = vadd.f32 %v1304_v46, %v1142_v51 }
 0x1a3   : > { %1324 = vmatpush3.bf16.msra.mxu1 %v1449_v27  ;;  %v889_v4 = vadd.f32 %v1142_v51, %v888_v47 }
 0x1a6   : > { %1306 = vmatmul.mubr.bf16.vlgmr.msra.gmra.mrb[8].mxu1 %v1453_v43 }
 0x259   : > { %v1279_v49 = vpop.f32.mrb[0].mxu1 }
 0x25a   : > { %v714_v52 = vmul.f32 %v1279_v49, %v1138_v48  ;;  %v674_v53 = vpop.f32.mrb[1].mxu1 }
 0x25b   : > { %v712_v54 = vmul.f32 %v1138_v48, %v674_v53  ;;  %v1280_v55 = vpop.f32.mrb[2].mxu1 }
 0x25c   : > { %v729_v56 = vadd.f32 %v1139_v50, %v714_v52  ;;  %v715_v57 = vmul.f32 %v1280_v55, %v1138_v48  ;;  %v677_v58 = vpop.f32.mrb[3].mxu1 }
 0x25d   : > { %v727_v60 = vadd.f32 %v1139_v50, %v712_v54  ;;  %v713_v61 = vmul.f32 %v1138_v48, %v677_v58 }
 0x25e   : > { %v737_v63 = vmax.f32 %v729_v56, 0.0  ;;  %v730_v0 = vadd.f32 %v1139_v50, %v715_v57 }
 0x25f   : > { %v735_v2 = vmax.f32 %v727_v60, 0.0  ;;  %v728_v3 = vadd.f32 %v1139_v50, %v713_v61 }
 0x260   : > { %v738_v5 = vmax.f32 %v730_v0, 0.0  ;;  %v918_v6 = vadd.f32 %v894_v59, %v737_v63 }
 0x261   : > { %v736_v7 = vmax.f32 %v728_v3, 0.0  ;;  %v916_v8 = vadd.f32 %v886_v62, %v735_v2  ;;  %v1283_v9 = vpop.f32.mrb[4].mxu1 }
 0x262   : > { %v919_v10 = vadd.f32 %v897_v1, %v738_v5  ;;  %v690_v11 = vpop.f32.mrb[5].mxu1  ;;  %v926_v14 = vmax.f32 %v918_v6, 0.0  ;;  %v718_v21 = vmul.f32 %v1283_v9, %v1138_v48 }
 0x263   : > { %v917_v12 = vadd.f32 %v889_v4, %v736_v7  ;;  %v1284_v13 = vpop.f32.mrb[6].mxu1  ;;  %v924_v17 = vmax.f32 %v916_v8, 0.0  ;;  %v716_v22 = vmul.f32 %v1138_v48, %v690_v11 }
 0x264   : > { %v927_v15 = vmax.f32 %v919_v10, 0.0  ;;  %v693_v16 = vpop.f32.mrb[7].mxu1  ;;  %v719_v23 = vmul.f32 %v1284_v13, %v1138_v48  ;;  %v733_v25 = vadd.f32 %v1139_v50, %v718_v21 }
 0x265   : > { %v925_v18 = vmax.f32 %v917_v12, 0.0  ;;  %v717_v24 = vmul.f32 %v1138_v48, %v693_v16  ;;  %v731_v26 = vadd.f32 %v1139_v50, %v716_v22 }
 0x266   : > { %v1186_v19 = vpack.c.bf16 %v927_v15, %v926_v14  ;;  %v734_v27 = vadd.f32 %v1139_v50, %v719_v23  ;;  %v741_v30 = vmax.f32 %v733_v25, 0.0 }
 0x267   : > { %v1181_v20 = vpack.c.bf16 %v925_v18, %v924_v17  ;;  %v732_v28 = vadd.f32 %v1139_v50, %v717_v24  ;;  %v739_v33 = vmax.f32 %v731_v26, 0.0 }
 0x268   : > { %1198 = vst [vmem:[%s1972_s12 + $0x8] sm:$0xff] %v1186_v19   ;;  %v742_v36 = vmax.f32 %v734_v27, 0.0 }
 0x269   : > { %1182 = vst [vmem:[%s1972_s12] sm:$0xff] %v1181_v20   ;;  %v740_v40 = vmax.f32 %v732_v28, 0.0 }
 0x279   : > { %v1307_v29 = vpop.f32.mrb[8].mxu1 }
 0x27a   : > { %v910_v31 = vadd.f32 %v1307_v29, %v1142_v51  ;;  %v901_v32 = vpop.f32.mrb[9].mxu1 }
 0x27b   : > { %v902_v34 = vadd.f32 %v1142_v51, %v901_v32  ;;  %v1308_v35 = vpop.f32.mrb[10].mxu1 }
 0x27c   : > { %v922_v37 = vadd.f32 %v910_v31, %v741_v30  ;;  %v913_v38 = vadd.f32 %v1308_v35, %v1142_v51  ;;  %v904_v39 = vpop.f32.mrb[11].mxu1 }
 0x27d   : > { %v920_v41 = vadd.f32 %v902_v34, %v739_v33  ;;  %v905_v42 = vadd.f32 %v1142_v51, %v904_v39 }
 0x27e   : > { %v923_v43 = vadd.f32 %v913_v38, %v742_v36  ;;  %v930_v45 = vmax.f32 %v922_v37, 0.0 }
 0x27f   : > { %v921_v44 = vadd.f32 %v905_v42, %v740_v40  ;;  %v928_v47 = vmax.f32 %v920_v41, 0.0 }
 0x280   : > { %v931_v46 = vmax.f32 %v923_v43, 0.0 }
 0x281   : > { %v929_v48 = vmax.f32 %v921_v44, 0.0 }
 0x282   : > { %v1196_v49 = vpack.c.bf16 %v931_v46, %v930_v45 }
 0x283   : > { %v1191_v50 = vpack.c.bf16 %v929_v48, %v928_v47 }
 0x284   : > { %1200 = vst [vmem:[%s1972_s12 + $0x18] sm:$0xff] %v1196_v49  }
 0x285   : > { %1199 = vst [vmem:[%s1972_s12 + $0x10] sm:$0xff] %v1191_v50  }
 0x286   : > { %1581 = shalt.err (!%p1578_p0)
}
 0x287   : > { %s1582_s15 = scalar_lea.hbm %s1983_s11, 512  ;;  %s1586_s24 = scalar_lea.hbm %s2067_s9, 1024 }
 0x288   : > { %p1583_p4 = scmp.ne.s32.totalorder %s1983_s11, %s1582_s15  ;;  %p1587_p12 = scmp.lt.u32.totalorder %s1983_s11, %s2067_s9 }
 0x289   : > { %p1588_p1 = scmp.lt.u32.totalorder %s1586_s24, %s1582_s15  ;;  %p1590_p13 = scmp.lt.u32.totalorder %s1582_s15, %s1983_s11 }
 0x28a   : > { %p1584_p2 = pnand %p1583_p4, %p1869_p10 }
 0x28b   : > { %p1589_p11 = por %p1588_p1, %p1587_p12 }
 0x28c   : > { %p1585_p8 = pneg %p1584_p2 }
 0x28d   : > { %p1591_p6 = por %p1590_p13, %p1589_p11 }
 0x28f   : > { %p1592_p3 = pnand %p1591_p6, %p1585_p8 }
 0x291   : > { %1595 = shalt.err (!%p1592_p3)
}
 0x292   : > { %s1667_s30 = smov 64   ;;  %s1668_s17 = smov 4  }
 0x293   : > { %1339 = dma.vmem_to_hbm [thread:$0]  (%p1869_p10), %s1978_s20, 512, %s1983_s11, %s973_s13, %s1667_s30, %s1667_s30, %s1668_s17  }
 0x294 PF: > { %s2068_s18 = sld [smem:[#allocation16_spill]]  ;;  %s2069_s27 = sld [smem:[#allocation17_spill]] }
 0x295   : > { %p2071_p7 = scmp.ge.s32.totalorder %s1658_s29, 2 }
 0x29a   : > { %s1001_s22 = sand.u32 1, %s2068_s18   ;;  %p2070_p5 = scmp.ne.s32.totalorder %s2069_s27, 0 }
 0x29b   : > { %s1002_s23 = scalar_lea.sflag [#allocation5], %s1001_s22 }
 0x29c   : > { %p1356_p9 = pnand %p2071_p7, %p2070_p5 }
 0x29e   : > { %1633 = dma.done.wait (!%p1356_p9), %s1002_s23, 512  }
 0x29f   : > { %1635 = vsyncadd (!%p1356_p9), %s1002_s23, 4294966784  ;;  %s25_s29 = sadd.s32 1, %s1658_s29   ;;  %s2072_s24 = smov %s1642_s25 }
 0x2a0   : > { %p22_p0 = scmp.ge.s32.totalorder %s25_s29, 4   ;;  %s2073_s25 = smov %s1646_s26 }
 0x2a1   : > { %s2074_s26 = smov %s1881_s8  ;;  %s2075_s27 = smov %s1654_s28 }
 0x2a2   : > { %s2076_s28 = smov %s2078_s16  ;;  %24 = sbr.rel (!%p22_p0) target bundleno = 11 (0xb), region = 115 }
 0x2a9   :  { %1007 = vsyncpa [#allocation4], 1 }
 0x2aa   :  { %1009 = vsyncpa [#allocation4 + $0x1], 1 }
 0x2ab   :  { %1010 = vsyncpa [#allocation7], 1 }
 0x2ac   :  { %1011 = vsyncpa [#allocation10], 1 }
 0x2ad   :  { %1012 = vsyncpa [#allocation5], 1 }
 0x2ae   :  { %1014 = vsyncpa [#allocation5 + $0x1], 1 }

</bundles_post_ra>
